<compile_context>
chip_gen: v6e
topology: v6e:2x2x1
jax: 0.10.0
libtpu: 0.0.40
codegen_flags: <defaults>
</compile_context>

<pallas_src>
import jax
import jax.numpy as jnp
from jax.experimental import pallas as pl
from jax.experimental.pallas import tpu as pltpu


_VMEM_BUDGET_BYTES = 8 * 1024 * 1024   # double-buffered input blocks
_MAX_TILE_ROWS = 1024                  # 512-1024 rows ~ 85% of HBM roofline


def _round_up(x, m):
    return ((x + m - 1) // m) * m


def _num_tensorcores():
    """2 on multi-TensorCore chips (v7x, v4/v5p megacore), 1 on v5e/v6e."""
    try:
        kind = jax.devices()[0].device_kind.lower()
    except Exception:
        return 1
    if any(tag in kind for tag in ("v7", "7x", "v4", "v5p")):
        return 2
    return 1


def _vmem_limit_bytes():
    """Derive the scoped-VMEM limit from the device so v7x's 64 MiB is respected.

    Capped at min(capacity/2, 32 MiB): leaves ample headroom for Mosaic-internal
    scratch (f32 cast / diff / square intermediates) and the output accumulators.
    """
    try:
        cap = int(pltpu.get_tpu_info().vmem_capacity_bytes)
    except Exception:
        cap = 64 * 1024 * 1024   # conservative (v7x per-TC)
    return int(min(cap // 2, 32 * 1024 * 1024))


def _bootstrap_loss_kernel(ep_ref, dp_ref, m_ref, loss_ref, msum_ref):
    i = pl.program_id(1)                      # streaming ("arbitrary") axis

    @pl.when(i == 0)
    def _():
        loss_ref[...] = jnp.zeros_like(loss_ref)
        msum_ref[...] = jnp.zeros_like(msum_ref)

    ep = ep_ref[...].astype(jnp.float32)      # (tile, D)
    dp = dp_ref[...].astype(jnp.float32)      # (tile, D)
    m = m_ref[...].astype(jnp.float32)        # (1, tile)  lane-dense mask row

    diff = ep - dp
    sq = diff * diff                          # (tile, D)

    # Masked row-reduction on the otherwise-idle MXU:
    #   (1, tile) @ (tile, D) -> (1, D), accumulated in f32.
    loss_ref[...] += jnp.dot(
        m, sq,
        preferred_element_type=jnp.float32,
        precision=jax.lax.Precision.HIGHEST,
    )
    # Mask sum: one cross-lane reduce per step (XLU; negligible).
    msum_ref[...] += jnp.sum(m, axis=1, keepdims=True)          # (1, 1)


def bootstrap_loss(encoder_pred, decoder_pred, mask, norm_pix_loss=False):
    """encoder_pred, decoder_pred: [N, L, D]; mask: [N, L] -> scalar f32."""
    assert not norm_pix_loss, "norm_pix_loss branch is unreachable/buggy upstream"
    N, L, D = encoder_pred.shape
    rows = N * L

    ep = encoder_pred.reshape(rows, D)
    dp = decoder_pred.reshape(rows, D)
    mk = mask.reshape(rows)

    cores = _num_tensorcores()

    # --- tile sizing: biggest row tile whose double-buffered input blocks fit
    # the VMEM budget.  Accounts for BOTH prediction dtypes (lane dim padded
    # to 128 in VMEM) AND the lane-dense mask block (sublane-padded to 8 rows).
    ep_item = jnp.dtype(encoder_pred.dtype).itemsize
    dp_item = jnp.dtype(decoder_pred.dtype).itemsize
    mk_item = jnp.dtype(mask.dtype).itemsize
    d_pad = _round_up(D, 128)
    per_row_bytes = 2 * d_pad * (ep_item + dp_item) + 2 * 8 * mk_item
    tile = _VMEM_BUDGET_BYTES // per_row_bytes
    tile = min(tile, _MAX_TILE_ROWS)
    per_core_rows = _round_up(-(-rows // cores), 8)
    tile = min(tile, per_core_rows)
    tile = max(8, (tile // 8) * 8)

    steps_per_core = -(-rows // (cores * tile))          # cdiv
    total_steps = cores * steps_per_core
    rows_pad = total_steps * tile

    pad = rows_pad - rows
    if pad:
        # Padded rows carry mask == 0 (and zero predictions), so they add
        # exactly 0 to both accumulators.
        ep = jnp.pad(ep, ((0, pad), (0, 0)))
        dp = jnp.pad(dp, ((0, pad), (0, 0)))
        mk = jnp.pad(mk, ((0, pad),))
    mk = mk.reshape(total_steps, tile)       # lane-dense: one mask row / step

    row_block = lambda c, i: (c * steps_per_core + i, 0)

    loss_parts, mask_parts = pl.pallas_call(
        _bootstrap_loss_kernel,
        out_shape=(
            jax.ShapeDtypeStruct((cores, 1, D), jnp.float32),
            jax.ShapeDtypeStruct((cores, 1, 1), jnp.float32),
        ),
        grid_spec=pltpu.PrefetchScalarGridSpec(
            num_scalar_prefetch=0,
            grid=(cores, steps_per_core),
            in_specs=[
                pl.BlockSpec((tile, D), row_block),
                pl.BlockSpec((tile, D), row_block),
                pl.BlockSpec((1, tile), row_block),
            ],
            out_specs=(
                pl.BlockSpec((None, 1, D), lambda c, i: (c, 0, 0)),
                pl.BlockSpec((None, 1, 1), lambda c, i: (c, 0, 0)),
            ),
        ),
        compiler_params=pltpu.CompilerParams(
            dimension_semantics=("parallel", "arbitrary"),
            vmem_limit_bytes=_vmem_limit_bytes(),
        ),
    )(ep, dp, mk)

    # Final combine: /D gives the per-row mean; then (loss*mask).sum()/mask.sum().
    return jnp.sum(loss_parts) / jnp.float32(D) / jnp.sum(mask_parts)


def _reference(encoder_pred, decoder_pred, mask):
    loss = jnp.mean((encoder_pred - decoder_pred) ** 2, axis=-1)
    return jnp.sum(loss * mask) / jnp.sum(mask)


if __name__ == "__main__":
    key = jax.random.PRNGKey(0)
    k1, k2, k3 = jax.random.split(key, 3)

    # Small MAE-like toy shapes: batch=2, 14 patches, patch dim=32
    # (rows=28 is intentionally not a multiple of 8, exercising the
    # ragged-tail zero-padding path and, on 2-TC chips, the core split).
    N, L, D = 2, 14, 32
    encoder_pred = jax.random.normal(k1, (N, L, D), dtype=jnp.float32)
    decoder_pred = jax.random.normal(k2, (N, L, D), dtype=jnp.float32)
    mask = (jax.random.uniform(k3, (N, L)) > 0.25).astype(jnp.float32)
    mask = mask.at[0, 0].set(1.0)  # ensure mask.sum() > 0

    loss = bootstrap_loss(encoder_pred, decoder_pred, mask)
    jax.block_until_ready(loss)
    ref = _reference(encoder_pred, decoder_pred, mask)
    assert jnp.allclose(loss, ref, atol=1e-5, rtol=1e-4), (loss, ref)

    # bf16 predictions stream through the kernel in bf16 (cast to f32 inside),
    # halving HBM traffic for bf16 models.
    ep_bf16 = encoder_pred.astype(jnp.bfloat16)
    dp_bf16 = decoder_pred.astype(jnp.bfloat16)
    loss_bf16 = bootstrap_loss(ep_bf16, dp_bf16, mask)
    jax.block_until_ready(loss_bf16)
    ref_bf16 = _reference(ep_bf16.astype(jnp.float32),
                          dp_bf16.astype(jnp.float32), mask)
    assert jnp.allclose(loss_bf16, ref_bf16, atol=1e-4, rtol=1e-4), (loss_bf16, ref_bf16)

    print("KERNEL_OK")
</pallas_src>

<mosaic_0001>
module attributes {stable_mosaic.version = 11 : i64} {
  func.func @_bootstrap_loss_kernel(%arg0: i32, %arg1: i32, %arg2: memref<32x32xf32, #tpu.memory_space<vmem>>, %arg3: memref<32x32xf32, #tpu.memory_space<vmem>>, %arg4: memref<1x32xf32, #tpu.memory_space<vmem>>, %arg5: memref<1x1x32xf32, #tpu.memory_space<vmem>>, %arg6: memref<1x1x1xf32, #tpu.memory_space<vmem>>) attributes {dimension_semantics = [#tpu.dimension_semantics<parallel>, #tpu.dimension_semantics<arbitrary>], iteration_bounds = array<i64: 1, 1>, scalar_prefetch = 0 : i64, scratch_operands = 0 : i64, tpu.core_type = #tpu.core_type<tc>, window_params = [{transform_indices = @transform_0, window_bounds = array<i64: 32, 32>}, {transform_indices = @transform_1, window_bounds = array<i64: 32, 32>}, {transform_indices = @transform_2, window_bounds = array<i64: 1, 32>}, {transform_indices = @transform_3, window_bounds = array<i64: 1, 1, 32>}, {transform_indices = @transform_4, window_bounds = array<i64: 1, 1, 1>}]} {
    %c0_i32 = arith.constant 0 : i32
    %0 = arith.cmpi eq, %arg1, %c0_i32 : i32
    %1 = arith.extui %0 : i1 to i32
    %c0_i32_0 = arith.constant 0 : i32
    %2 = arith.cmpi ne, %1, %c0_i32_0 : i32
    scf.if %2 {
      %cst_19 = arith.constant 0.000000e+00 : f32
      %23 = vector.broadcast %cst_19 : f32 to vector<1x32xf32>
      %c0_20 = arith.constant 0 : index
      %c0_21 = arith.constant 0 : index
      %c0_22 = arith.constant 0 : index
      %24 = vector.load %arg5[%c0_20, %c0_21, %c0_22] : memref<1x1x32xf32, #tpu.memory_space<vmem>>, vector<1x1x32xf32>
      %25 = vector.shape_cast %24 : vector<1x1x32xf32> to vector<1x32xf32>
      %26 = vector.shape_cast %23 : vector<1x32xf32> to vector<1x1x32xf32>
      tpu.vector_store %arg5[%c0_20, %c0_21, %c0_22], %26 {strides = array<i32>} : memref<1x1x32xf32, #tpu.memory_space<vmem>>, vector<1x1x32xf32>,
      %cst_23 = arith.constant 0.000000e+00 : f32
      %27 = vector.broadcast %cst_23 : f32 to vector<1x1xf32>
      %c0_24 = arith.constant 0 : index
      %c0_25 = arith.constant 0 : index
      %c0_26 = arith.constant 0 : index
      %28 = vector.load %arg6[%c0_24, %c0_25, %c0_26] : memref<1x1x1xf32, #tpu.memory_space<vmem>>, vector<1x1x1xf32>
      %29 = vector.shape_cast %28 : vector<1x1x1xf32> to vector<1x1xf32>
      %30 = vector.shape_cast %27 : vector<1x1xf32> to vector<1x1x1xf32>
      tpu.vector_store %arg6[%c0_24, %c0_25, %c0_26], %30 {strides = array<i32>} : memref<1x1x1xf32, #tpu.memory_space<vmem>>, vector<1x1x1xf32>,
    } else {
    }
    %c0 = arith.constant 0 : index
    %c0_1 = arith.constant 0 : index
    %3 = vector.load %arg2[%c0, %c0_1] : memref<32x32xf32, #tpu.memory_space<vmem>>, vector<32x32xf32>
    %c0_2 = arith.constant 0 : index
    %c0_3 = arith.constant 0 : index
    %4 = vector.load %arg3[%c0_2, %c0_3] : memref<32x32xf32, #tpu.memory_space<vmem>>, vector<32x32xf32>
    %c0_4 = arith.constant 0 : index
    %c0_5 = arith.constant 0 : index
    %5 = vector.load %arg4[%c0_4, %c0_5] : memref<1x32xf32, #tpu.memory_space<vmem>>, vector<1x32xf32>
    %6 = arith.subf %3, %4 : vector<32x32xf32>
    %7 = arith.mulf %6, %6 : vector<32x32xf32>
    %c0_6 = arith.constant 0 : index
    %c0_7 = arith.constant 0 : index
    %c0_8 = arith.constant 0 : index
    %8 = vector.load %arg5[%c0_6, %c0_7, %c0_8] : memref<1x1x32xf32, #tpu.memory_space<vmem>>, vector<1x1x32xf32>
    %9 = vector.shape_cast %8 : vector<1x1x32xf32> to vector<1x32xf32>
    %cst = arith.constant dense<0.000000e+00> : vector<1x32xf32>
    %10 = tpu.matmul %5, %7, %cst {dimension_numbers = #tpu.dot_dimension_numbers<[1], [0], [0], [1], [0, 0, 1, 1], [], []>, precision = #tpu.contract_precision<fp32>} : vector<1x32xf32>, vector<32x32xf32>, vector<1x32xf32> -> vector<1x32xf32>
    %11 = arith.addf %9, %10 : vector<1x32xf32>
    %c0_9 = arith.constant 0 : index
    %c0_10 = arith.constant 0 : index
    %c0_11 = arith.constant 0 : index
    %12 = vector.load %arg5[%c0_9, %c0_10, %c0_11] : memref<1x1x32xf32, #tpu.memory_space<vmem>>, vector<1x1x32xf32>
    %13 = vector.shape_cast %12 : vector<1x1x32xf32> to vector<1x32xf32>
    %14 = vector.shape_cast %11 : vector<1x32xf32> to vector<1x1x32xf32>
    tpu.vector_store %arg5[%c0_9, %c0_10, %c0_11], %14 {strides = array<i32>} : memref<1x1x32xf32, #tpu.memory_space<vmem>>, vector<1x1x32xf32>,
    %c0_12 = arith.constant 0 : index
    %c0_13 = arith.constant 0 : index
    %c0_14 = arith.constant 0 : index
    %15 = vector.load %arg6[%c0_12, %c0_13, %c0_14] : memref<1x1x1xf32, #tpu.memory_space<vmem>>, vector<1x1x1xf32>
    %16 = vector.shape_cast %15 : vector<1x1x1xf32> to vector<1x1xf32>
    %cst_15 = arith.constant dense<0.000000e+00> : vector<1xf32>
    %17 = vector.multi_reduction <add>, %5, %cst_15 [1] : vector<1x32xf32> to vector<1xf32>
    %18 = vector.shape_cast %17 : vector<1xf32> to vector<1x1xf32>
    %19 = arith.addf %16, %18 : vector<1x1xf32>
    %c0_16 = arith.constant 0 : index
    %c0_17 = arith.constant 0 : index
    %c0_18 = arith.constant 0 : index
    %20 = vector.load %arg6[%c0_16, %c0_17, %c0_18] : memref<1x1x1xf32, #tpu.memory_space<vmem>>, vector<1x1x1xf32>
    %21 = vector.shape_cast %20 : vector<1x1x1xf32> to vector<1x1xf32>
    %22 = vector.shape_cast %19 : vector<1x1xf32> to vector<1x1x1xf32>
    tpu.vector_store %arg6[%c0_16, %c0_17, %c0_18], %22 {strides = array<i32>} : memref<1x1x1xf32, #tpu.memory_space<vmem>>, vector<1x1x1xf32>,
    return
  }
  func.func @transform_0(%arg0: i32, %arg1: i32) -> (i32, i32) {
    %c1_i32 = arith.constant 1 : i32
    %0 = arith.muli %arg0, %c1_i32 : i32
    %1 = arith.addi %0, %arg1 : i32
    %c0_i32 = arith.constant 0 : i32
    %c0_i32_0 = arith.constant 0 : i32
    return %1, %c0_i32 : i32, i32
  }
  func.func @transform_1(%arg0: i32, %arg1: i32) -> (i32, i32) {
    %c1_i32 = arith.constant 1 : i32
    %0 = arith.muli %arg0, %c1_i32 : i32
    %1 = arith.addi %0, %arg1 : i32
    %c0_i32 = arith.constant 0 : i32
    %c0_i32_0 = arith.constant 0 : i32
    return %1, %c0_i32 : i32, i32
  }
  func.func @transform_2(%arg0: i32, %arg1: i32) -> (i32, i32) {
    %c1_i32 = arith.constant 1 : i32
    %0 = arith.muli %arg0, %c1_i32 : i32
    %1 = arith.addi %0, %arg1 : i32
    %c0_i32 = arith.constant 0 : i32
    %c0_i32_0 = arith.constant 0 : i32
    return %1, %c0_i32 : i32, i32
  }
  func.func @transform_3(%arg0: i32, %arg1: i32) -> (i32, i32, i32) {
    %c0_i32 = arith.constant 0 : i32
    %c0_i32_0 = arith.constant 0 : i32
    %c0_i32_1 = arith.constant 0 : i32
    return %arg0, %c0_i32, %c0_i32_0 : i32, i32, i32
  }
  func.func @transform_4(%arg0: i32, %arg1: i32) -> (i32, i32, i32) {
    %c0_i32 = arith.constant 0 : i32
    %c0_i32_0 = arith.constant 0 : i32
    %c0_i32_1 = arith.constant 0 : i32
    return %arg0, %c0_i32, %c0_i32_0 : i32, i32, i32
  }
}

</mosaic_0001>

<bundles_post_ra>
// kernel: tpu_custom_call.1
= control target key start
LH: loop header
LB: loop body
LE: loop exit
PB: predicated region body
PF: predicated region fallthrough
CT: control target
= control target key end

     0   :  { %10 = vsyncpa [#allocation3], 0  ;;  %s941_s0 = inlined_call_operand.hbm [shape: f32[32,32], index: 0, kind: input, shape index: {}]   ;;  %s942_s1 = inlined_call_operand.hbm [shape: f32[32,32], index: 1, kind: input, shape index: {}]   ;;  %s943_s2 = inlined_call_operand.vmem [shape: f32[1,32], index: 2, kind: input, shape index: {}]   ;;  %s944_s3 = inlined_call_operand.hbm [shape: f32[1,1,32], index: 3, kind: output, shape index: {0}]   ;;  %s945_s4 = inlined_call_operand.hbm [shape: f32[1,1,1], index: 4, kind: output, shape index: {1}]  }
   0x1   :  { %11 = vsyncpa [#allocation6], 0 }
   0x2   :  { %12 = vsyncpa [#allocation4], 0 }
   0x3   :  { %13 = vsyncpa [#allocation9], 0  ;;  %s822_s15 = smov [#allocation2]  }
   0x4   :  { %s23_s16 = sshll.u32 %s822_s15, 4  ;;  %s24_s16 = int_to_ptr.vmem [resolvable:$true] %s23_s16 }
   0x5   :  { %s742_s17 = scalar_lea.vmem %s24_s16, 512  ;;  %p747_p1 = scmp.lt.s32.totalorder %s24_s16, %s24_s16 }
   0x6   :  { %p743_p0 = scmp.ne.s32.totalorder %s24_s16, %s742_s17  ;;  %p748_p2 = scmp.lt.s32.totalorder %s742_s17, %s742_s17 }
   0x8   :  { %p749_p3 = por %p748_p2, %p747_p1 }
   0xa   :  { %p750_p4 = pnand %p749_p3, %p743_p0 }
   0xc   :  { %753 = shalt.err (!%p750_p4)
}
   0xd   :  { %s823_s18 = smov 128   ;;  %s824_s19 = smov 8  }
   0xe   :  { %29 = dma.hbm_to_vmem [thread:$0]  %s941_s0, 512, %s24_s16, [#allocation3], %s823_s18, %s823_s18, %s824_s19  }
   0xf   :  { %s825_s22 = smov [#allocation5]  }
  0x10   :  { %s39_s23 = sshll.u32 %s825_s22, 4  ;;  %s40_s23 = int_to_ptr.vmem [resolvable:$true] %s39_s23 }
  0x11   :  { %s762_s24 = scalar_lea.vmem %s40_s23, 512  ;;  %p767_p6 = scmp.lt.s32.totalorder %s40_s23, %s40_s23 }
  0x12   :  { %p763_p5 = scmp.ne.s32.totalorder %s40_s23, %s762_s24  ;;  %p768_p7 = scmp.lt.s32.totalorder %s762_s24, %s762_s24 }
  0x14   :  { %p769_p8 = por %p768_p7, %p767_p6 }
  0x16   :  { %p770_p9 = pnand %p769_p8, %p763_p5 }
  0x18   :  { %773 = shalt.err (!%p770_p9)
}
  0x19   :  { %45 = dma.hbm_to_vmem [thread:$0]  %s942_s1, 512, %s40_s23, [#allocation6], %s823_s18, %s823_s18, %s824_s19  }
  0x1a   :  { %814 = dma.done.wait [#allocation3], 512  }
  0x1b   :  { %815 = vsyncadd [#allocation3], 4294966784 }
  0x1c   :  { %816 = dma.done.wait [#allocation6], 512  }
  0x1d   :  { %817 = vsyncadd [#allocation6], 4294966784  ;;  %vm76_vm0 = vcmask 253952   ;;  %v826_v0 = vmov 0.0   ;;  %vm827_vm1 = vmmov 0   ;;  %v83_v1 = vld [vmem:[#allocation2 + $0x18] sm:$0xff] }
  0x1e   :  { %660 = vmatprep.subr.mxu0 %v826_v0  ;;  %671 = vmatprep.subr.mxu1 %v826_v0  ;;  %77 = vst.msk [vmem:[#allocation7] sm:$0x1] %vm76_vm0, %v826_v0  ;;  %v87_v2 = vld [vmem:[#allocation5 + $0x18] sm:$0xff]  ;;  %v82_v3 = vld [vmem:[#allocation2 + $0x10] sm:$0xff]  ;;  %vm98_vm2 = vcmask 261120   ;;  %v81_v6 = vld [vmem:[#allocation2 + $0x8] sm:$0xff] }
  0x1f   :  { %668 = vmatprep.mubr.msk.f32.mxu0 %vm827_vm1, %v826_v0  ;;  %679 = vmatprep.mubr.msk.f32.mxu1 %vm827_vm1, %v826_v0  ;;  %v92_v4 = vsub.f32 %v83_v1, %v87_v2  ;;  %v86_v5 = vld [vmem:[#allocation5 + $0x10] sm:$0xff]  ;;  %v85_v7 = vld [vmem:[#allocation5 + $0x8] sm:$0xff]  ;;  %v80_v10 = vld [vmem:[#allocation2] sm:$0xff]  ;;  %vm78_vm3 = vcmask 0  }
  0x20   :  { %v91_v8 = vsub.f32 %v82_v3, %v86_v5  ;;  %v90_v9 = vsub.f32 %v81_v6, %v85_v7  ;;  %v84_v11 = vld [vmem:[#allocation5] sm:$0xff]  ;;  %79 = vst.msk [vmem:[#allocation8] sm:$0x1] %vm78_vm3, %v826_v0 }
  0x21   :  { %v88_v12 = vld [vmem:[%s943_s2] sm:$0x1]  ;;  %v96_v13 = vmul.f32 %v92_v4, %v92_v4  ;;  %v89_v14 = vsub.f32 %v80_v10, %v84_v11  ;;  %s828_s2 = smov [#allocation8]  }
  0x22   :  { %v100_v15 = vsel %vm98_vm2, %v88_v12, 0  ;;  %v591_v16 = vsel %vm76_vm0, %v88_v12, 0.0  ;;  %v95_v17 = vmul.f32 %v91_v8, %v91_v8  ;;  %v94_v18 = vmul.f32 %v90_v9, %v90_v9  ;;  %s613_s27 = sshll.u32 %s828_s2, 4  ;;  %s614_s27 = int_to_ptr.vmem [resolvable:$true] %s613_s27 }
  0x23   :  { %v873_v19 = vand.u32 4294901760, %v100_v15  ;;  %592 = vadd.xlane.f32.xlu0 %v591_v16  ;;  %v875_v20 = vand.u32 4294901760, %v96_v13  ;;  %v93_v21 = vmul.f32 %v89_v14, %v89_v14  ;;  %s774_s28 = scalar_lea.vmem %s614_s27, 16  ;;  %s778_s29 = scalar_lea.vmem %s614_s27, 32 }
  0x24   :  { %v877_v22 = vand.u32 4294901760, %v95_v17  ;;  %v879_v23 = vand.u32 4294901760, %v94_v18  ;;  %p775_p10 = scmp.ne.s32.totalorder %s614_s27, %s774_s28  ;;  %p779_p11 = scmp.lt.s32.totalorder %s614_s27, %s614_s27 }
  0x25   :  { %v172_v24 = vsub.f32 %v100_v15, %v873_v19  ;;  %661 = vmatpush3.msra.mxu0 %v875_v20  ;;  %v883_v25 = vand.u32 4294901760, %v93_v21  ;;  %v207_v26 = vsub.f32 %v96_v13, %v875_v20  ;;  %p780_p12 = scmp.lt.s32.totalorder %s778_s29, %s774_s28 }
  0x26   :  { %662 = vmatprep.subr.mxu0 %v826_v0  ;;  %v214_v28 = vsub.f32 %v95_v17, %v877_v22  ;;  %v221_v29 = vsub.f32 %v94_v18, %v879_v23 }
  0x27   :  { %v173_v27 = vand.u32 4294901760, %v172_v24  ;;  %663 = vmatpush3.msra.mxu0 %v877_v22  ;;  %v208_v30 = vand.u32 4294901760, %v207_v26  ;;  %v228_v31 = vsub.f32 %v93_v21, %v883_v25  ;;  %v590_v45 = vld [vmem:[#allocation8] sm:$0x1]  ;;  %p781_p13 = por %p780_p12, %p779_p11 }
  0x28   :  { %664 = vmatprep.subr.mxu0 %v826_v0  ;;  %v215_v33 = vand.u32 4294901760, %v214_v28  ;;  %v222_v34 = vand.u32 4294901760, %v221_v29 }
  0x29   :  { %v174_v32 = vsub.f32 %v172_v24, %v173_v27  ;;  %665 = vmatpush3.msra.mxu0 %v879_v23  ;;  %v209_v35 = vsub.f32 %v207_v26, %v208_v30  ;;  %v229_v36 = vand.u32 4294901760, %v228_v31  ;;  %p782_p0 = pnand %p781_p13, %p775_p10 }
  0x2a   :  { %666 = vmatprep.subr.mxu0 %v826_v0  ;;  %v216_v38 = vsub.f32 %v214_v28, %v215_v33  ;;  %v223_v39 = vsub.f32 %v221_v29, %v222_v34 }
  0x2b   :  { %v175_v37 = vand.u32 4294901760, %v174_v32  ;;  %667 = vmatpush3.msra.mxu0 %v883_v25  ;;  %v210_v40 = vand.u32 4294901760, %v209_v35  ;;  %v230_v41 = vsub.f32 %v228_v31, %v229_v36 }
  0x2c   :  { %682 = vmatprep.subr.mxu0 %v826_v0  ;;  %v217_v42 = vand.u32 4294901760, %v216_v38  ;;  %v224_v43 = vand.u32 4294901760, %v223_v39 }
  0x2d   :  { %669 = vmatmul.mubr.f32.vlgmr.msra.gmra.mxu0 %v175_v37  ;;  %672 = vmatpush3.msra.mxu1 %v210_v40  ;;  %v231_v44 = vand.u32 4294901760, %v230_v41 }
  0x2e   :  { %683 = vmatpush3.msra.mxu0 %v207_v26  ;;  %673 = vmatprep.subr.mxu1 %v826_v0 }
  0x2f   :  { %684 = vmatprep.subr.mxu0 %v826_v0  ;;  %674 = vmatpush3.msra.mxu1 %v217_v42 }
  0x30   :  { %685 = vmatpush3.msra.mxu0 %v214_v28  ;;  %675 = vmatprep.subr.mxu1 %v826_v0 }
  0x31   :  { %686 = vmatprep.subr.mxu0 %v826_v0  ;;  %676 = vmatpush3.msra.mxu1 %v224_v43 }
  0x32   :  { %687 = vmatpush3.msra.mxu0 %v221_v29  ;;  %677 = vmatprep.subr.mxu1 %v826_v0 }
  0x33   :  { %688 = vmatprep.subr.mxu0 %v826_v0  ;;  %678 = vmatpush3.msra.mxu1 %v231_v44 }
  0x34   :  { %689 = vmatpush3.msra.mxu0 %v228_v31  ;;  %680 = vmatmul.mubr.f32.vlgmr.msra.gmra.mxu1 %v873_v19 }
  0x35   :  { %693 = vmatprep.subr.mxu1 %v826_v0  ;;  %690 = vmatprep.mubr.msk.f32.mxu0 %vm827_vm1, %v826_v0 }
  0x36   :  { %694 = vmatpush3.msra.mxu1 %v875_v20  ;;  %691 = vmatmul.mubr.f32.vlgmr.msra.gmra.mxu0 %v172_v24 }
  0x37   :  { %695 = vmatprep.subr.mxu1 %v826_v0  ;;  %704 = vmatprep.subr.mxu0 %v826_v0 }
  0x38   :  { %696 = vmatpush3.msra.mxu1 %v877_v22  ;;  %705 = vmatpush3.msra.mxu0 %v208_v30 }
  0x39   :  { %697 = vmatprep.subr.mxu1 %v826_v0  ;;  %706 = vmatprep.subr.mxu0 %v826_v0 }
  0x3a   :  { %698 = vmatpush3.msra.mxu1 %v879_v23  ;;  %707 = vmatpush3.msra.mxu0 %v215_v33 }
  0x3b   :  { %699 = vmatprep.subr.mxu1 %v826_v0  ;;  %708 = vmatprep.subr.mxu0 %v826_v0 }
  0x3c   :  { %700 = vmatpush3.msra.mxu1 %v883_v25  ;;  %701 = vmatprep.mubr.msk.f32.mxu1 %vm827_vm1, %v826_v0 }
  0x3d   :  { %709 = vmatpush3.msra.mxu0 %v222_v34  ;;  %702 = vmatmul.mubr.f32.vlgmr.msra.gmra.mxu1 %v173_v27 }
  0x3e   :  { %710 = vmatprep.subr.mxu0 %v826_v0  ;;  %715 = vmatprep.subr.mxu1 %v826_v0 }
  0x3f   :  { %711 = vmatpush3.msra.mxu0 %v229_v36  ;;  %712 = vmatprep.mubr.msk.f32.mxu0 %vm827_vm1, %v826_v0 }
  0x40   :  { %716 = vmatpush3.msra.mxu1 %v875_v20  ;;  %713 = vmatmul.mubr.f32.vlgmr.msra.gmra.mxu0 %v873_v19 }
  0x41   :  { %717 = vmatprep.subr.mxu1 %v826_v0  ;;  %723 = vmatprep.mubr.msk.f32.mxu1 %vm827_vm1, %v826_v0 }
  0x42   :  { %718 = vmatpush3.msra.mxu1 %v877_v22 }
  0x43   :  { %719 = vmatprep.subr.mxu1 %v826_v0 }
  0x44   :  { %720 = vmatpush3.msra.mxu1 %v879_v23 }
  0x45   :  { %721 = vmatprep.subr.mxu1 %v826_v0 }
  0x46   :  { %722 = vmatpush3.msra.mxu1 %v883_v25 }
  0x47   :  { %724 = vmatmul.mubr.f32.vlgmr.msra.gmra.mxu1 %v873_v19 }
  0xac   :  { %v593_v46 = vpop.xlane.xlu0 %592 }
  0xad   :  { %v594_v47 = vadd.f32 %v593_v46, %v590_v45 }
  0xaf   :  { %596 = vst.msk [vmem:[#allocation8] sm:$0x1] %vm78_vm3, %v594_v47 }
  0xb0   :  { %785 = shalt.err (!%p782_p0)
}
  0xb1   :  { %616 = dma.vmem_to_hbm [thread:$0]  %s614_s27, 16, %s945_s4, [#allocation9]   ;;  %v97_v62 = vld [vmem:[#allocation7] sm:$0x1] }
  0xb2   :  { %s829_s6 = smov [#allocation7]  }
  0xb3   :  { %s603_s7 = sshll.u32 %s829_s6, 4  ;;  %s604_s7 = int_to_ptr.vmem [resolvable:$true] %s603_s7 }
  0xb4   :  { %s794_s4 = scalar_lea.vmem %s604_s7, 16  ;;  %s798_s8 = scalar_lea.vmem %s604_s7, 32 }
  0xb5   :  { %p795_p1 = scmp.ne.s32.totalorder %s604_s7, %s794_s4  ;;  %p799_p2 = scmp.lt.s32.totalorder %s604_s7, %s604_s7 }
  0xb6   :  { %p800_p3 = scmp.lt.s32.totalorder %s798_s8, %s794_s4 }
  0xb8   :  { %p801_p4 = por %p800_p3, %p799_p2 }
  0xba   :  { %p802_p5 = pnand %p801_p4, %p795_p1 }
  0xed   :  { %v177_v48 = vpop.f32.mrf.mxu0 }
  0xef   :  { %v670_v49 = vpop.f32.mrf.mxu0 }
  0xf4   :  { %v268_v50 = vpop.f32.mrf.mxu1 }
  0xf5   :  { %v269_v54 = vadd.f32 %v268_v50, %v177_v48 }
  0xf6   :  { %v681_v51 = vpop.f32.mrf.mxu1  ;;  %v348_v52 = vpop.f32.mrf.mxu0 }
  0xf7   :  { %v349_v56 = vadd.f32 %v348_v52, %v269_v54 }
  0xf8   :  { %v692_v53 = vpop.f32.mrf.mxu0 }
  0xfd   :  { %v425_v55 = vpop.f32.mrf.mxu1 }
  0xfe   :  { %v426_v59 = vadd.f32 %v425_v55, %v349_v56 }
  0xff   :  { %v703_v57 = vpop.f32.mrf.mxu1 }
 0x100   :  { %v508_v58 = vpop.f32.mrf.mxu0 }
 0x101   :  { %v509_v61 = vadd.f32 %v508_v58, %v426_v59 }
 0x102   :  { %v714_v60 = vpop.f32.mrf.mxu0 }
 0x107   :  { %v583_v63 = vpop.f32.mrf.mxu1 }
 0x108   :  { %v584_v0 = vadd.f32 %v583_v63, %v509_v61 }
 0x109   :  { %v725_v1 = vpop.f32.mrf.mxu1 }
 0x10a   :  { %v587_v2 = vadd.f32 %v584_v0, %v97_v62 }
 0x10c   :  { %589 = vst.msk [vmem:[#allocation7] sm:$0x1] %vm76_vm0, %v587_v2 }
 0x10d   :  { %805 = shalt.err (!%p802_p5)
}
 0x10e   :  { %606 = dma.vmem_to_hbm [thread:$0]  %s604_s7, 16, %s944_s3, [#allocation4]  }
 0x10f   :  { %818 = dma.done.wait [#allocation4], 16  }
 0x110   :  { %819 = vsyncadd [#allocation4], 4294967280 }
 0x111   :  { %820 = dma.done.wait [#allocation9], 16  }
 0x112   :  { %821 = vsyncadd [#allocation9], 4294967280 }
 0x113   :  { %623 = vsyncpa [#allocation3], 1 }
 0x114   :  { %624 = vsyncpa [#allocation6], 1 }
 0x115   :  { %625 = vsyncpa [#allocation4], 1 }
 0x116   :  { %626 = vsyncpa [#allocation9], 1 }

</bundles_post_ra>
